<compile_context>
chip_gen: v7x
topology: tpu7x:2x2x1
jax: 0.10.0
libtpu: 0.0.40
codegen_flags: <defaults>
</compile_context>

<pallas_src>
import jax
import jax.numpy as jnp
from jax.experimental import pallas as pl
from jax.experimental.pallas import tpu as pltpu


def _add_pos_kernel(x_ref, pos_ref, o_ref):
    # x_ref: (tb, tf) tile of the flattened (B, N*D) input
    # pos_ref: (1, tf) tile of the flattened positional table (broadcast over rows)
    o_ref[...] = x_ref[...] + pos_ref[...]


# Per x-tile budget (~4 MiB). Worst-case resident VMEM:
#   2 (double-buffered) x-tiles + 2 out-tiles + 2 pos-tiles
#   <= 2*4 + 2*4 + 2*4 = 24 MiB, under the explicit 48 MiB vmem limit below
# on every generation (v5e/v6e have 128 MiB physical; v7x has 64 MiB total).
_TILE_BYTES = 4 * 1024 * 1024
_VMEM_LIMIT_BYTES = 48 << 20


def _choose_tiles(B, F, itemsize):
    """Pick (tb, tf) for the (B, F) flattened problem.

    Invariants:
      * tf is a multiple of 128, or tf == F (full lane dim).
      * tb is a multiple of the dtype-aware sublane packing, or tb == B.
      * tb * tf * itemsize stays at (or only marginally above) _TILE_BYTES.
    Tiles that do not evenly divide B/F are handled by pl.cdiv grids with a
    masked tail block.
    """
    # Sub-32-bit dtypes pack 2/4 rows per sublane; keep tb packing-aligned.
    pack = max(1, 4 // itemsize)      # f32 -> 1, bf16 -> 2, int8/fp8 -> 4
    sub = 8 * pack                    # row-tile multiple

    tile_elems = max(128, _TILE_BYTES // itemsize)

    # ---- lane (last-dim) tile ----
    if F <= tile_elems:
        tf = F
    elif F % 128 == 0:
        # Largest multiple-of-128 divisor of F within budget; if the
        # factorization is awkward (no divisor near the cap), fall back to a
        # non-dividing multiple-of-128 tile with a masked tail.
        units = F // 128
        cap_units = max(1, tile_elems // 128)
        best_units = 0
        for d in range(min(units, cap_units), 0, -1):
            if units % d == 0:
                best_units = d
                break
        if best_units * 128 >= (cap_units * 128) // 2:
            tf = best_units * 128
        else:
            tf = cap_units * 128
    else:
        # F not a multiple of 128 and too big to take whole: multiple-of-128
        # block, masked tail tile on the last grid step.
        tf = max(128, (tile_elems // 128) * 128)

    # ---- row (second-minor) tile, jointly capped with tf ----
    max_rows = max(1, tile_elems // tf)
    if B <= max_rows:
        tb = B
    elif max_rows >= sub:
        tb = (max_rows // sub) * sub
    else:
        # Budget allows < one sublane group; take one group (tiny overshoot)
        # or the whole (small) batch — never fall back to all of a large B.
        tb = min(sub, B)

    # ---- v7x megacore: avoid a single-step grid for non-trivial problems ----
    # Two TensorCores per chip on v7x; give each at least one block when the
    # problem is big enough that splitting beats the extra per-step overhead.
    steps = pl.cdiv(F, tf) * pl.cdiv(B, tb)
    if steps == 1 and B * F * itemsize > (2 << 20):
        if tf % 256 == 0:
            tf //= 2
        elif tb > sub:
            half = max(sub, ((tb // 2 + sub - 1) // sub) * sub)
            if half < tb:
                tb = half

    return tb, tf


def learnable_pos_forward(x, pos):
    """x: (B, N, D), pos: (1, N, D) -> (B, N, D), computed as x + pos."""
    B, N, D = x.shape
    assert pos.shape == (1, N, D)

    # Cast the parameter once in the wrapper (avoids per-tile promote/demote
    # and halves pos DMA traffic when x is bf16 and pos is fp32). Note: this
    # is a pre-add downcast; output dtype matches x either way.
    pos = pos.astype(x.dtype)

    # Flatten tokens into the lane dim so the output is lane-dense.
    F = N * D
    x2 = x.reshape(B, F)
    p2 = pos.reshape(1, F)

    itemsize = jnp.dtype(x.dtype).itemsize
    tb, tf = _choose_tiles(B, F, itemsize)

    # Lanes outer, rows inner: the pos block index (0, j) is constant over the
    # inner (row) axis, so the invariant pos tile is reused, not re-DMA'd,
    # across all row tiles of a given lane tile.
    grid = (pl.cdiv(F, tf), pl.cdiv(B, tb))

    out2 = pl.pallas_call(
        _add_pos_kernel,
        out_shape=jax.ShapeDtypeStruct((B, F), x.dtype),
        grid_spec=pltpu.PrefetchScalarGridSpec(
            num_scalar_prefetch=0,
            grid=grid,
            in_specs=[
                pl.BlockSpec((tb, tf), lambda j, i: (i, j)),   # x tile
                pl.BlockSpec((1, tf), lambda j, i: (0, j)),    # pos tile (bcast)
            ],
            out_specs=pl.BlockSpec((tb, tf), lambda j, i: (i, j)),
        ),
        compiler_params=pltpu.CompilerParams(
            # Pure elementwise op: both grid axes independent -> megacore can
            # shard them on v7x once the grid has multiple steps.
            dimension_semantics=("parallel", "parallel"),
            # Explicit limit: above v5e (16 MiB) / v6e (32 MiB) scoped
            # defaults, with headroom under v7x's 64 MiB total VMEM.
            vmem_limit_bytes=_VMEM_LIMIT_BYTES,
        ),
    )(x2, p2)

    return out2.reshape(B, N, D)


if __name__ == "__main__":
    # Module shapes: LearnablePos(n_tokens=8, d_model=32), batch=2.
    # Flattened this is a single lane-dense (2, 256) block -> grid (1, 1):
    # one grid step, unmasked 128-lane stores.
    B, n_tokens, d_model = 2, 8, 32

    key = jax.random.PRNGKey(0)
    kx, kp = jax.random.split(key)

    x = jax.random.normal(kx, (B, n_tokens, d_model), dtype=jnp.float32)
    # nn.Parameter(torch.zeros(1, n_tokens, d_model)) at init; use non-zero
    # values so the broadcast-add is actually exercised.
    pos = 0.01 * jax.random.normal(kp, (1, n_tokens, d_model), dtype=jnp.float32)

    out = learnable_pos_forward(x, pos)
    out = jax.block_until_ready(out)

    ref = x + pos  # broadcasting reference, same as the PyTorch forward
    assert out.shape == (B, n_tokens, d_model)
    assert out.dtype == x.dtype
    assert jnp.allclose(out, ref, atol=1e-6, rtol=1e-6)

    print("KERNEL_OK")
</pallas_src>

<mosaic_0001>
module attributes {stable_mosaic.version = 11 : i64} {
  func.func @_add_pos_kernel(%arg0: i32, %arg1: i32, %arg2: memref<2x256xf32, #tpu.memory_space<vmem>>, %arg3: memref<1x256xf32, #tpu.memory_space<vmem>>, %arg4: memref<2x256xf32, #tpu.memory_space<vmem>>) attributes {dimension_semantics = [#tpu.dimension_semantics<parallel>, #tpu.dimension_semantics<parallel>], iteration_bounds = array<i64: 1, 1>, scalar_prefetch = 0 : i64, scratch_operands = 0 : i64, tpu.core_type = #tpu.core_type<tc>, window_params = [{transform_indices = @transform_0, window_bounds = array<i64: 2, 256>}, {transform_indices = @transform_1, window_bounds = array<i64: 1, 256>}, {transform_indices = @transform_2, window_bounds = array<i64: 2, 256>}]} {
    %c0 = arith.constant 0 : index
    %c0_0 = arith.constant 0 : index
    %0 = vector.load %arg2[%c0, %c0_0] : memref<2x256xf32, #tpu.memory_space<vmem>>, vector<2x256xf32>
    %c0_1 = arith.constant 0 : index
    %c0_2 = arith.constant 0 : index
    %1 = vector.load %arg3[%c0_1, %c0_2] : memref<1x256xf32, #tpu.memory_space<vmem>>, vector<1x256xf32>
    %2 = vector.broadcast %1 : vector<1x256xf32> to vector<2x256xf32>
    %3 = arith.addf %0, %2 : vector<2x256xf32>
    %c0_3 = arith.constant 0 : index
    %c0_4 = arith.constant 0 : index
    %4 = vector.load %arg4[%c0_3, %c0_4] : memref<2x256xf32, #tpu.memory_space<vmem>>, vector<2x256xf32>
    tpu.vector_store %arg4[%c0_3, %c0_4], %3 {strides = array<i32>} : memref<2x256xf32, #tpu.memory_space<vmem>>, vector<2x256xf32>,
    return
  }
  func.func @transform_0(%arg0: i32, %arg1: i32) -> (i32, i32) {
    %c0_i32 = arith.constant 0 : i32
    return %arg1, %arg0 : i32, i32
  }
  func.func @transform_1(%arg0: i32, %arg1: i32) -> (i32, i32) {
    %c0_i32 = arith.constant 0 : i32
    %c0_i32_0 = arith.constant 0 : i32
    return %c0_i32, %arg0 : i32, i32
  }
  func.func @transform_2(%arg0: i32, %arg1: i32) -> (i32, i32) {
    %c0_i32 = arith.constant 0 : i32
    return %arg1, %arg0 : i32, i32
  }
}

</mosaic_0001>

<bundles_post_ra>
// kernel: tpu_custom_call.1
= control target key start
LH: loop header
LB: loop body
LE: loop exit
PB: predicated region body
PF: predicated region fallthrough
CT: control target
= control target key end

     0   :  { %7 = vsyncpa [#allocation3], 0  ;;  %s157_s0 = inlined_call_operand.hbm [shape: f32[2,256], index: 0, kind: input, shape index: {}]   ;;  %s158_s1 = inlined_call_operand.vmem [shape: f32[1,256], index: 1, kind: input, shape index: {}]   ;;  %s159_s2 = inlined_call_operand.hbm [shape: f32[2,256], index: 2, kind: output, shape index: {}]  }
   0x1   :  { %8 = vsyncpa [#allocation4], 0  ;;  %s112_s9 = smov [#allocation2]   ;;  %s64_s13 = scalar_lea.hbm %s157_s0, 64 }
   0x2   :  { %s15_s10 = sshll.u32 %s112_s9, 4  ;;  %p65_p0 = scmp.ne.s32.totalorder %s157_s0, %s64_s13  ;;  %s16_s10 = int_to_ptr.vmem [resolvable:$true] %s15_s10 }
   0x3   :  { %p68_p1 = scmp.lt.u32.totalorder %s64_s13, %s157_s0 }
   0x5   :  { %p70_p2 = pnand %p68_p1, %p65_p0 }
   0x7   :  { %73 = shalt.err (!%p70_p2)
}
   0x8   :  { %s74_s18 = scalar_lea.vmem %s16_s10, 64  ;;  %p79_p4 = scmp.lt.s32.totalorder %s16_s10, %s16_s10 }
   0x9   :  { %p75_p3 = scmp.ne.s32.totalorder %s16_s10, %s74_s18  ;;  %p80_p5 = scmp.lt.s32.totalorder %s74_s18, %s74_s18 }
   0xb   :  { %p81_p6 = por %p80_p5, %p79_p4 }
   0xd   :  { %p82_p7 = pnand %p81_p6, %p75_p3 }
   0xf   :  { %85 = shalt.err (!%p82_p7)
}
  0x10   :  { %18 = dma.hbm_to_vmem [thread:$0]  %s157_s0, 64, %s16_s10, [#allocation3]  }
  0x11   :  { %108 = dma.done.wait [#allocation3], 64  }
  0x12   :  { %109 = vsyncadd [#allocation3], 4294967232  ;;  %v27_v0 = vlaneseq  ;;  %v113_v1 = vmov 1983009808   ;;  %v25_v7 = vld [vmem:[%s158_s1] sm:$0x3] }
  0x13   :  { %v37_v2 = vunpack.c.l.s4 %v113_v1  ;;  %v24_v12 = vld [vmem:[#allocation2] sm:$0xf]  ;;  %s114_s23 = smov [#allocation5]  }
  0x14   :  { %v28_v3 = vshrl.u32 %v27_v0, 7  ;;  %s52_s0 = sshll.u32 %s114_s23, 4  ;;  %s53_s0 = int_to_ptr.vmem [resolvable:$true] %s52_s0 }
  0x15   :  { %v38_v6 = vunpack.c.0.s8 %v37_v2  ;;  %s86_s24 = scalar_lea.vmem %s53_s0, 64  ;;  %p91_p9 = scmp.lt.s32.totalorder %s53_s0, %s53_s0 }
  0x16   :  { %v29_v4 = vsub.s32 0, %v28_v3  ;;  %v33_v5 = vsub.s32 1, %v28_v3  ;;  %p87_p8 = scmp.ne.s32.totalorder %s53_s0, %s86_s24  ;;  %p92_p10 = scmp.lt.s32.totalorder %s86_s24, %s86_s24 }
  0x17   :  { %v41_v10 = vsub.s32 %v38_v6, %v28_v3 }
  0x18   :  { %v30_v8 = vrot.slane %v25_v7, %v29_v4  ;;  %v34_v9 = vrot.slane %v25_v7, %v33_v5  ;;  %p93_p11 = por %p92_p10, %p91_p9 }
  0x1a   :  { %v35_v11 = vcombine.low %v30_v8, %v34_v9  ;;  %p94_p12 = pnand %p93_p11, %p87_p8 }
  0x1c   :  { %v42_v13 = vrot.slane %v35_v11, %v41_v10 }
  0x1e   :  { %v44_v14 = vadd.f32 %v42_v13, %v24_v12 }
  0x20   :  { %45 = vst [vmem:[#allocation5] sm:$0xf] %v44_v14 }
  0x21   :  { %97 = shalt.err (!%p94_p12)
}
  0x22   :  { %s98_s26 = scalar_lea.hbm %s159_s2, 64 }
  0x23   :  { %p99_p13 = scmp.ne.s32.totalorder %s159_s2, %s98_s26  ;;  %p102_p0 = scmp.lt.u32.totalorder %s98_s26, %s159_s2 }
  0x25   :  { %p104_p1 = pnand %p102_p0, %p99_p13 }
  0x27   :  { %107 = shalt.err (!%p104_p1)
}
  0x28   :  { %55 = dma.vmem_to_hbm [thread:$0]  %s53_s0, 64, %s159_s2, [#allocation4]  }
  0x29   :  { %110 = dma.done.wait [#allocation4], 64  }
  0x2a   :  { %111 = vsyncadd [#allocation4], 4294967232 }
  0x2b   :  { %59 = vsyncpa [#allocation3], 1 }
  0x2c   :  { %60 = vsyncpa [#allocation4], 1 }

</bundles_post_ra>
